<compile_context>
chip_gen: v5e
topology: v5e:2x2
jax: 0.10.0
libtpu: 0.0.40
codegen_flags: <defaults>
</compile_context>

<pallas_src>
import jax
import jax.numpy as jnp
from jax.experimental import pallas as pl
from jax.experimental.pallas import tpu as pltpu


def _round_up(x, m):
    return ((x + m - 1) // m) * m


def mlp_kernel(w1t_ref, b1_ref, w2_ref, b2_ref, x_ref, o_ref):
    # w1t_ref: (20, 10)  first-layer weight, transposed (out, in) - resident
    # b1_ref : (20, 1)   first-layer bias as a column (broadcast over lanes)
    # w2_ref : (20, 1)   second-layer weight as a column
    # b2_ref : (1, 1)    second-layer bias, scalar in SMEM
    # x_ref  : (10, TB)  input tile, batch on the lane axis
    # o_ref  : (1, TB)   output tile, batch on the lane axis (lane-dense store)
    h = jnp.dot(w1t_ref[...], x_ref[...], preferred_element_type=jnp.float32)
    h = jnp.maximum(h + b1_ref[...], 0.0)
    # Output width is 1: use VPU multiply + XLU sublane-reduce instead of a
    # second (nearly empty) MXU matmul.
    out = jnp.sum(h * w2_ref[...], axis=0, keepdims=True) + b2_ref[0, 0]
    o_ref[...] = out.astype(o_ref.dtype)


def mlp_forward(x, w1, b1, w2, b2, *, tile_b=4096):
    """x: (B, 10); w1: (10, 20); b1: (1, 20); w2: (20, 1); b2: (1, 1) -> (B, 1)."""
    B, in_f = x.shape
    hid = w1.shape[1]

    # Batch on lanes: pad B up to a multiple of the lane-tile width.
    tb = min(tile_b, _round_up(B, 128))
    Bp = _round_up(B, tb)
    xt = x.T  # (10, B)
    if Bp != B:
        xt = jnp.pad(xt, ((0, 0), (0, Bp - B)))

    w1t = w1.T                 # (20, 10)
    b1c = b1.reshape(hid, 1)   # (20, 1)
    w2c = w2.reshape(hid, 1)   # (20, 1)
    b2s = b2.reshape(1, 1)     # (1, 1)

    grid = (Bp // tb,)
    out_t = pl.pallas_call(
        mlp_kernel,
        out_shape=jax.ShapeDtypeStruct((1, Bp), jnp.float32),
        grid=grid,
        in_specs=[
            # Weights / biases: constant index maps -> DMA'd once, stay in VMEM.
            pl.BlockSpec((hid, in_f), lambda i: (0, 0)),
            pl.BlockSpec((hid, 1), lambda i: (0, 0)),
            pl.BlockSpec((hid, 1), lambda i: (0, 0)),
            # Scalar second-layer bias lives in SMEM (no VMEM buffer slot).
            pl.BlockSpec(memory_space=pltpu.MemorySpace.SMEM),
            # Input tile: batch on lanes, double-buffered across the grid.
            pl.BlockSpec((in_f, tb), lambda i: (0, i)),
        ],
        out_specs=pl.BlockSpec((1, tb), lambda i: (0, i)),
        compiler_params=pltpu.CompilerParams(
            dimension_semantics=("parallel",),  # megacore sharding on v7x
        ),
    )(w1t, b1c, w2c, b2s, xt)

    return out_t[:, :B].T  # (B, 1)


def init_params(key):
    # Deterministic init mimicking PyTorch nn.Linear default
    # (uniform(-1/sqrt(fan_in), 1/sqrt(fan_in))).
    k1, k2, k3, k4 = jax.random.split(key, 4)
    in1, out1 = 10, 20
    in2, out2 = 20, 1
    bound1 = 1.0 / jnp.sqrt(jnp.float32(in1))
    bound2 = 1.0 / jnp.sqrt(jnp.float32(in2))
    # stored as (in, out) so the reference computes x @ W
    w1 = jax.random.uniform(k1, (in1, out1), jnp.float32, -bound1, bound1)
    b1 = jax.random.uniform(k2, (1, out1), jnp.float32, -bound1, bound1)
    w2 = jax.random.uniform(k3, (in2, out2), jnp.float32, -bound2, bound2)
    b2 = jax.random.uniform(k4, (1, out2), jnp.float32, -bound2, bound2)
    return w1, b1, w2, b2


if __name__ == "__main__":
    key = jax.random.PRNGKey(0)
    kx, kp, kx2 = jax.random.split(key, 3)

    w1, b1, w2, b2 = init_params(kp)

    # Small case (matches the module's intended use).
    batch = 8
    x = jax.random.normal(kx, (batch, 10), jnp.float32)
    out = jax.block_until_ready(mlp_forward(x, w1, b1, w2, b2))
    ref = jnp.maximum(x @ w1 + b1, 0.0) @ w2 + b2
    assert out.shape == (batch, 1)
    assert jnp.allclose(out, ref, atol=1e-5, rtol=1e-5)

    # Exercise the batch grid (multiple tiles + padding of a ragged batch).
    batch2 = 300
    x2 = jax.random.normal(kx2, (batch2, 10), jnp.float32)
    out2 = jax.block_until_ready(mlp_forward(x2, w1, b1, w2, b2, tile_b=128))
    ref2 = jnp.maximum(x2 @ w1 + b1, 0.0) @ w2 + b2
    assert out2.shape == (batch2, 1)
    assert jnp.allclose(out2, ref2, atol=1e-5, rtol=1e-5)

    print("KERNEL_OK")
</pallas_src>

<mosaic_0001>
module attributes {stable_mosaic.version = 11 : i64} {
  func.func @mlp_kernel(%arg0: i32, %arg1: memref<20x10xf32, #tpu.memory_space<vmem>>, %arg2: memref<20x1xf32, #tpu.memory_space<vmem>>, %arg3: memref<20x1xf32, #tpu.memory_space<vmem>>, %arg4: memref<1x1xf32, #tpu.memory_space<smem>>, %arg5: memref<10x128xf32, #tpu.memory_space<vmem>>, %arg6: memref<1x128xf32, #tpu.memory_space<vmem>>) attributes {dimension_semantics = [#tpu.dimension_semantics<parallel>], iteration_bounds = array<i64: 1>, scalar_prefetch = 0 : i64, scratch_operands = 0 : i64, tpu.core_type = #tpu.core_type<tc>, window_params = [{pipeline_mode = #tpu.pipeline_mode<synchronous>, transform_indices = @transform_0, window_bounds = array<i64: 20, 10>}, {pipeline_mode = #tpu.pipeline_mode<synchronous>, transform_indices = @transform_1, window_bounds = array<i64: 20, 1>}, {pipeline_mode = #tpu.pipeline_mode<synchronous>, transform_indices = @transform_2, window_bounds = array<i64: 20, 1>}, {transform_indices = @transform_3, window_bounds = array<i64: 1, 1>}, {transform_indices = @transform_4, window_bounds = array<i64: 10, 128>}, {transform_indices = @transform_5, window_bounds = array<i64: 1, 128>}]} {
    %c0 = arith.constant 0 : index
    %c0_0 = arith.constant 0 : index
    %0 = vector.load %arg1[%c0, %c0_0] : memref<20x10xf32, #tpu.memory_space<vmem>>, vector<20x10xf32>
    %c0_1 = arith.constant 0 : index
    %c0_2 = arith.constant 0 : index
    %1 = vector.load %arg5[%c0_1, %c0_2] : memref<10x128xf32, #tpu.memory_space<vmem>>, vector<10x128xf32>
    %cst = arith.constant dense<0.000000e+00> : vector<20x128xf32>
    %2 = tpu.matmul %0, %1, %cst {dimension_numbers = #tpu.dot_dimension_numbers<[1], [0], [0], [1], [0, 0, 1, 1], [], []>} : vector<20x10xf32>, vector<10x128xf32>, vector<20x128xf32> -> vector<20x128xf32>
    %c0_3 = arith.constant 0 : index
    %c0_4 = arith.constant 0 : index
    %3 = vector.load %arg2[%c0_3, %c0_4] : memref<20x1xf32, #tpu.memory_space<vmem>>, vector<20x1xf32>
    %4 = vector.broadcast %3 : vector<20x1xf32> to vector<20x128xf32>
    %5 = arith.addf %2, %4 : vector<20x128xf32>
    %cst_5 = arith.constant 0.000000e+00 : f32
    %6 = vector.broadcast %cst_5 : f32 to vector<20x128xf32>
    %7 = arith.maximumf %5, %6 : vector<20x128xf32>
    %c0_6 = arith.constant 0 : index
    %c0_7 = arith.constant 0 : index
    %8 = vector.load %arg3[%c0_6, %c0_7] : memref<20x1xf32, #tpu.memory_space<vmem>>, vector<20x1xf32>
    %9 = vector.broadcast %8 : vector<20x1xf32> to vector<20x128xf32>
    %10 = arith.mulf %7, %9 : vector<20x128xf32>
    %cst_8 = arith.constant dense<0.000000e+00> : vector<128xf32>
    %11 = vector.multi_reduction <add>, %10, %cst_8 [0] : vector<20x128xf32> to vector<128xf32>
    %12 = vector.shape_cast %11 : vector<128xf32> to vector<1x128xf32>
    %c0_9 = arith.constant 0 : index
    %c0_10 = arith.constant 0 : index
    %13 = memref.load %arg4[%c0_9, %c0_10] : memref<1x1xf32, #tpu.memory_space<smem>>
    %14 = vector.broadcast %13 : f32 to vector<1x128xf32>
    %15 = arith.addf %12, %14 : vector<1x128xf32>
    %c0_11 = arith.constant 0 : index
    %c0_12 = arith.constant 0 : index
    %16 = vector.load %arg6[%c0_11, %c0_12] : memref<1x128xf32, #tpu.memory_space<vmem>>, vector<1x128xf32>
    tpu.vector_store %arg6[%c0_11, %c0_12], %15 {strides = array<i32>} : memref<1x128xf32, #tpu.memory_space<vmem>>, vector<1x128xf32>,
    return
  }
  func.func @transform_0(%arg0: i32) -> (i32, i32) {
    %c0_i32 = arith.constant 0 : i32
    %c0_i32_0 = arith.constant 0 : i32
    %c0_i32_1 = arith.constant 0 : i32
    return %c0_i32, %c0_i32_0 : i32, i32
  }
  func.func @transform_1(%arg0: i32) -> (i32, i32) {
    %c0_i32 = arith.constant 0 : i32
    %c0_i32_0 = arith.constant 0 : i32
    %c0_i32_1 = arith.constant 0 : i32
    return %c0_i32, %c0_i32_0 : i32, i32
  }
  func.func @transform_2(%arg0: i32) -> (i32, i32) {
    %c0_i32 = arith.constant 0 : i32
    %c0_i32_0 = arith.constant 0 : i32
    %c0_i32_1 = arith.constant 0 : i32
    return %c0_i32, %c0_i32_0 : i32, i32
  }
  func.func @transform_3(%arg0: i32) -> (i32, i32) {
    %c0_i32 = arith.constant 0 : i32
    %c0_i32_0 = arith.constant 0 : i32
    %c0_i32_1 = arith.constant 0 : i32
    return %c0_i32, %c0_i32_0 : i32, i32
  }
  func.func @transform_4(%arg0: i32) -> (i32, i32) {
    %c0_i32 = arith.constant 0 : i32
    %c0_i32_0 = arith.constant 0 : i32
    return %c0_i32, %arg0 : i32, i32
  }
  func.func @transform_5(%arg0: i32) -> (i32, i32) {
    %c0_i32 = arith.constant 0 : i32
    %c0_i32_0 = arith.constant 0 : i32
    return %c0_i32, %arg0 : i32, i32
  }
}

</mosaic_0001>

<bundles_post_ra>
// kernel: tpu_custom_call.1
= control target key start
LH: loop header
LB: loop body
LE: loop exit
PB: predicated region body
PF: predicated region fallthrough
CT: control target
= control target key end

     0   :  { %vm55_vm0 = vcmask 1041408   ;;  %v178_v3 = vmov 0   ;;  %vm45_vm1 = vcmask 80896   ;;  %s249_s0 = inlined_call_operand.vmem [shape: f32[20,10], index: 0, kind: input, shape index: {}]   ;;  %s250_s1 = inlined_call_operand.vmem [shape: f32[20,1], index: 1, kind: input, shape index: {}]   ;;  %s251_s2 = inlined_call_operand.vmem [shape: f32[20,1], index: 2, kind: input, shape index: {}]   ;;  %s252_s3 = inlined_call_operand.<no memory space> [shape: f32[1,1], index: 3, kind: input, shape index: {}]   ;;  %s253_s4 = inlined_call_operand.vmem [shape: f32[10,128], index: 4, kind: input, shape index: {}]   ;;  %s254_s5 = inlined_call_operand.hbm [shape: f32[1,128], index: 5, kind: output, shape index: {}]  }
   0x1   :  { %v26_v0 = vld [vmem:[%s253_s4 + $0x8] sm:$0x3]  ;;  %v25_v1 = vld [vmem:[%s253_s4] sm:$0xff]  ;;  %149 = vset.pattern.permute.xlu0 %v178_v3  ;;  %v24_v6 = vld [vmem:[%s249_s0 + $0x10] sm:$0xf] }
   0x2   :  { %139 = vmatpush.msk.msra.mxu0 %vm55_vm0, %v26_v0  ;;  %143 = vmatpush.msk.msra.mxu1 %vm55_vm0, %v26_v0  ;;  %v27_v2 = vld [vmem:[%s250_s1] sm:$0xff]  ;;  %v23_v5 = vld [vmem:[%s249_s0 + $0x8] sm:$0xff] }
   0x3   :  { %144 = vmatpush.msk.msra.mxu2 %vm55_vm0, %v26_v0  ;;  %v22_v4 = vld [vmem:[%s249_s0] sm:$0xff] }
   0x4   :  { %74 = vmatpush.msra.mxu0 %v25_v1  ;;  %145 = vmatpush.msra.mxu1 %v25_v1 }
   0x5   :  { %11 = vsyncpa [#allocation4], 0  ;;  %146 = vmatpush.msra.mxu2 %v25_v1  ;;  %32 = vperm.xlu0 %149, %v27_v2   ;;  %v29_v7 = vld [vmem:[%s250_s1 + $0x10] sm:$0xf]  ;;  %v89_v8 = vld [vmem:[%s251_s2 + $0x8] sm:$0xff]  ;;  %vm110_vm2 = vcmask 1043456   ;;  %v120_v38 = vstv %s252_s3 }
   0x6   :  { %140 = vmatmul.msk.f32.vlgmr.msra.gmra.mxu0 %vm45_vm1, %v22_v4  ;;  %141 = vmatmul.msk.f32.vlgmr.msra.gmra.mxu1 %vm45_vm1, %v23_v5  ;;  %v28_v9 = vld [vmem:[%s250_s1 + $0x8] sm:$0xff]  ;;  %v88_v10 = vld [vmem:[%s251_s2] sm:$0xff]  ;;  %v90_v11 = vld [vmem:[%s251_s2 + $0x10] sm:$0xf]  ;;  %s179_s13 = smov [#allocation3]   ;;  %s130_s17 = sshll.u32 %s254_s5, 4  ;;  %s131_s17 = int_to_ptr.hbm [resolvable:$true] %s130_s17 }
   0x7   :  { %142 = vmatmul.msk.f32.vlgmr.msra.gmra.mxu2 %vm45_vm1, %v24_v6  ;;  %150 = vset.pattern.permute.xlu1 %v178_v3  ;;  %s128_s14 = sshll.u32 %s179_s13, 4  ;;  %s129_s14 = int_to_ptr.vmem [resolvable:$true] %s128_s14 }
   0x8   :  { %42 = vperm.xlu1 %150, %v29_v7   ;;  %151 = vset.pattern.permute.xlu2 %v178_v3 }
   0x9   :  { %98 = vperm.xlu2 %151, %v89_v8  }
   0xd   :  { %37 = vperm.xlu0 %149, %v28_v9  }
  0x10   :  { %93 = vperm.xlu1 %150, %v88_v10  }
  0x11   :  { %103 = vperm.xlu2 %151, %v90_v11  }
  0x63   :  { %v99_v17 = vpop.permute.xlu2 %98 }
  0x6b   :  { %v104_v28 = vpop.permute.xlu2 %103 }
  0x77   :  { %v33_v12 = vpop.permute.xlu0 %32 }
  0x7a   :  { %v43_v13 = vpop.permute.xlu1 %42 }
  0x7f   :  { %v38_v14 = vpop.permute.xlu0 %37 }
  0x82   :  { %v94_v23 = vpop.permute.xlu1 %93 }
  0x83   :  { %v76_v15 = vpop.f32.mrf.mxu0  ;;  %v79_v16 = vpop.f32.mrf.mxu1 }
  0x84   :  { %v77_v18 = vadd.f32 %v76_v15, %v33_v12  ;;  %v80_v19 = vadd.f32 %v79_v16, %v38_v14 }
  0x86   :  { %v85_v20 = vmax.f32 %v77_v18, 0.0  ;;  %v86_v21 = vmax.f32 %v80_v19, 0.0 }
  0x88   :  { %v107_v25 = vmul.f32 %v99_v17, %v86_v21  ;;  %v106_v26 = vmul.f32 %v94_v23, %v85_v20 }
  0x8a   :  { %v82_v22 = vpop.f32.mrf.mxu2  ;;  %v109_v30 = vadd.f32 %v107_v25, %v106_v26 }
  0x8b   :  { %v83_v24 = vadd.f32 %v82_v22, %v43_v13 }
  0x8d   :  { %v87_v27 = vmax.f32 %v83_v24, 0.0 }
  0x8f   :  { %v108_v29 = vmul.f32 %v104_v28, %v87_v27 }
  0x91   :  { %v111_v31 = vsel %vm110_vm2, %v108_v29, 0.0 }
  0x92   :  { %v112_v32 = vadd.f32 %v111_v31, %v109_v30 }
  0x94   :  { %v113_v33 = vrot.slane %v112_v32, 4 }
  0x96   :  { %v114_v34 = vadd.f32 %v113_v33, %v112_v32 }
  0x98   :  { %v115_v35 = vrot.slane %v114_v34, 2 }
  0x9a   :  { %v116_v36 = vadd.f32 %v115_v35, %v114_v34 }
  0x9c   :  { %v117_v37 = vrot.slane %v116_v36, 1 }
  0x9e   :  { %v118_v39 = vadd.f32 %v117_v37, %v116_v36 }
  0xa0   :  { %v121_v40 = vadd.f32 %v120_v38, %v118_v39 }
  0xa2   :  { %122 = vst [vmem:[#allocation3] sm:$0x1] %v121_v40 }
  0xa3   :  { %133 = dma.vmem_to_hbm [thread:$0]  %s129_s14, 16, %s131_s17, [#allocation4]  }
  0xa4   :  { %176 = dma.done.wait [#allocation4], 16  }
  0xa5   :  { %177 = vsyncadd [#allocation4], 4294967280 }
  0xa6   :  { %138 = vsyncpa [#allocation4], 1 }

</bundles_post_ra>
